<compile_context>
chip_gen: v7x
topology: tpu7x:2x2x1
jax: 0.10.0
libtpu: 0.0.40
codegen_flags: <defaults>
</compile_context>

<pallas_src>
import jax
import jax.numpy as jnp
from jax.experimental import pallas as pl
from jax.experimental.pallas import tpu as pltpu


def _linear_block_kernel(x_ref, w_ref, b_ref, o_ref):
    # x_ref: (bimg, C_in,  T)  activation block (T spatial positions on the lane axis)
    # w_ref: (C_out, C_in)     BN-scale-folded weight (grid-invariant, single-buffered)
    # b_ref: (C_out, 1)        folded BN bias (f32), broadcast over lanes
    # o_ref: (bimg, C_out, T)
    w = w_ref[...]
    b = b_ref[...]
    for i in range(x_ref.shape[0]):            # bimg is small and static: unrolled
        acc = jnp.dot(w, x_ref[i], preferred_element_type=jnp.float32)   # (C_out, T) f32
        o_ref[i] = (acc + b).astype(o_ref.dtype)


def _round_up(x, m):
    return -(-x // m) * m


def _choose_blocking(n, c_in, c_out, hw, itemsize, target_block_bytes):
    """Pick (images per block, spatial tile) so each grid step moves ~target bytes of x+y."""
    per_col = (c_in + c_out) * itemsize              # bytes of x + y per spatial column
    cols = max(128, target_block_bytes // per_col)   # spatial columns per step at the target
    if hw <= cols:
        tile = hw                                    # full spatial dim: exempt from 128 rule
        bimg = max(1, min(n, cols // hw))            # pack several images per block
        if n >= 2 and pl.cdiv(n, bimg) < 2:          # keep >=2 steps so both v7x TCs get work
            bimg = (n + 1) // 2
    else:
        tile = max(128, (cols // 128) * 128)         # lane-dense spatial tile
        bimg = 1
    # Single-step grid only happens for n == 1 with tile == hw; split HW when it is big enough.
    if pl.cdiv(n, bimg) * pl.cdiv(hw, tile) < 2 and hw >= 256:
        tile = max(128, _round_up(pl.cdiv(hw, 2), 128))
        bimg = 1
    return bimg, tile


def make_linear_block(conv_w, bn_gamma, bn_beta, bn_mean, bn_var, eps=1e-5,
                      target_block_bytes=2 << 20):
    """Fold BN into the 1x1-conv weight once and return a jitted NCHW forward fn."""
    c_out, c_in, kh, kw = conv_w.shape
    assert (kh, kw) == (1, 1), "only kernel=(1,1) (module default) is supported"

    scale = (bn_gamma.astype(jnp.float32) /
             jnp.sqrt(bn_var.astype(jnp.float32) + eps))                       # (C_out,)
    w_folded = conv_w.reshape(c_out, c_in).astype(jnp.float32) * scale[:, None]
    bias = (bn_beta.astype(jnp.float32)
            - bn_mean.astype(jnp.float32) * scale).reshape(c_out, 1)            # f32 bias

    @jax.jit
    def forward(x_nchw):
        n, cx, h, w = x_nchw.shape
        assert cx == c_in
        hw = h * w
        dtype = x_nchw.dtype
        itemsize = jnp.dtype(dtype).itemsize

        # bf16 inputs -> bf16 weight feeding the MXU; accumulation / bias stay f32 in-kernel.
        w_mat = w_folded.astype(dtype)

        bimg, tile = _choose_blocking(n, c_in, c_out, hw, itemsize, target_block_bytes)
        grid = (pl.cdiv(n, bimg), pl.cdiv(hw, tile))

        # Double-buffered activation blocks + single-buffered weight/bias residency.
        x_blk = bimg * c_in * tile * itemsize
        y_blk = bimg * c_out * tile * itemsize
        vmem_need = 2 * (x_blk + y_blk) + c_out * c_in * itemsize + c_out * 4
        vmem_limit = int(min(max(vmem_need + (8 << 20), 32 << 20), 56 << 20))

        x_flat = x_nchw.reshape(n, c_in, hw)          # free: contiguous view, HW on lane axis

        out_flat = pl.pallas_call(
            _linear_block_kernel,
            out_shape=jax.ShapeDtypeStruct((n, c_out, hw), dtype),
            grid_spec=pltpu.PrefetchScalarGridSpec(
                num_scalar_prefetch=0,
                grid=grid,
                in_specs=[
                    pl.BlockSpec((bimg, c_in, tile), lambda i, t: (i, 0, t)),
                    pl.BlockSpec((c_out, c_in), lambda i, t: (0, 0),
                                 pipeline_mode=pl.Buffered(1)),
                    pl.BlockSpec((c_out, 1), lambda i, t: (0, 0),
                                 pipeline_mode=pl.Buffered(1)),
                ],
                out_specs=pl.BlockSpec((bimg, c_out, tile), lambda i, t: (i, 0, t)),
            ),
            compiler_params=pltpu.CompilerParams(
                dimension_semantics=("parallel", "parallel"),
                vmem_limit_bytes=vmem_limit),
        )(x_flat, w_mat, bias)

        return out_flat.reshape(n, c_out, h, w)       # free: contiguous view

    return forward


def linear_block_forward(x_nchw, conv_w, bn_gamma, bn_beta, bn_mean, bn_var, eps=1e-5):
    """Convenience one-shot wrapper; for repeated calls, build once with make_linear_block."""
    return make_linear_block(conv_w, bn_gamma, bn_beta, bn_mean, bn_var, eps)(x_nchw)


def _reference(x_nchw, conv_w, bn_gamma, bn_beta, bn_mean, bn_var, eps=1e-5):
    # Plain-JAX reference: 1x1 conv == channel einsum, then eval-mode BN.
    y = jnp.einsum("nchw,oc->nohw", x_nchw,
                   conv_w.reshape(conv_w.shape[0], conv_w.shape[1]))
    scale = bn_gamma / jnp.sqrt(bn_var + eps)
    return y * scale[None, :, None, None] + (bn_beta - bn_mean * scale)[None, :, None, None]


if __name__ == "__main__":
    key = jax.random.PRNGKey(0)
    k1, k2, k3, k4, k5, k6 = jax.random.split(key, 6)

    N, C_in, H, W = 2, 4, 16, 16
    C_out = 8

    x = jax.random.normal(k1, (N, C_in, H, W), dtype=jnp.float32)
    conv_w = jax.random.normal(k2, (C_out, C_in, 1, 1), dtype=jnp.float32) * 0.1
    bn_gamma = jax.random.normal(k3, (C_out,), dtype=jnp.float32) * 0.1 + 1.0
    bn_beta = jax.random.normal(k4, (C_out,), dtype=jnp.float32) * 0.1
    bn_mean = jax.random.normal(k5, (C_out,), dtype=jnp.float32) * 0.1
    bn_var = jax.random.uniform(k6, (C_out,), dtype=jnp.float32, minval=0.5, maxval=1.5)

    fwd = make_linear_block(conv_w, bn_gamma, bn_beta, bn_mean, bn_var)
    out = jax.block_until_ready(fwd(x))

    ref = _reference(x, conv_w, bn_gamma, bn_beta, bn_mean, bn_var)
    assert out.shape == (N, C_out, H, W)
    assert jnp.allclose(out, ref, atol=1e-4, rtol=1e-4), "mismatch vs reference"

    print("KERNEL_OK")
</pallas_src>

<mosaic_0001>
module attributes {stable_mosaic.version = 11 : i64} {
  func.func @_linear_block_kernel(%arg0: i32, %arg1: i32, %arg2: memref<1x4x256xf32, #tpu.memory_space<vmem>>, %arg3: memref<8x4xf32, #tpu.memory_space<vmem>>, %arg4: memref<8x1xf32, #tpu.memory_space<vmem>>, %arg5: memref<1x8x256xf32, #tpu.memory_space<vmem>>) attributes {dimension_semantics = [#tpu.dimension_semantics<parallel>, #tpu.dimension_semantics<parallel>], iteration_bounds = array<i64: 2, 1>, scalar_prefetch = 0 : i64, scratch_operands = 0 : i64, tpu.core_type = #tpu.core_type<tc>, window_params = [{transform_indices = @transform_0, window_bounds = array<i64: 1, 4, 256>}, {pipeline_mode = #tpu.pipeline_mode<synchronous>, transform_indices = @transform_1, window_bounds = array<i64: 8, 4>}, {pipeline_mode = #tpu.pipeline_mode<synchronous>, transform_indices = @transform_2, window_bounds = array<i64: 8, 1>}, {transform_indices = @transform_3, window_bounds = array<i64: 1, 8, 256>}]} {
    %c0 = arith.constant 0 : index
    %c0_0 = arith.constant 0 : index
    %0 = vector.load %arg3[%c0, %c0_0] : memref<8x4xf32, #tpu.memory_space<vmem>>, vector<8x4xf32>
    %c0_1 = arith.constant 0 : index
    %c0_2 = arith.constant 0 : index
    %1 = vector.load %arg4[%c0_1, %c0_2] : memref<8x1xf32, #tpu.memory_space<vmem>>, vector<8x1xf32>
    %c0_3 = arith.constant 0 : index
    %c0_4 = arith.constant 0 : index
    %c0_5 = arith.constant 0 : index
    %2 = vector.load %arg2[%c0_3, %c0_4, %c0_5] : memref<1x4x256xf32, #tpu.memory_space<vmem>>, vector<1x4x256xf32>
    %3 = vector.shape_cast %2 : vector<1x4x256xf32> to vector<4x256xf32>
    %cst = arith.constant dense<0.000000e+00> : vector<8x256xf32>
    %4 = tpu.matmul %0, %3, %cst {dimension_numbers = #tpu.dot_dimension_numbers<[1], [0], [0], [1], [0, 0, 1, 1], [], []>} : vector<8x4xf32>, vector<4x256xf32>, vector<8x256xf32> -> vector<8x256xf32>
    %5 = vector.broadcast %1 : vector<8x1xf32> to vector<8x256xf32>
    %6 = arith.addf %4, %5 : vector<8x256xf32>
    %c0_6 = arith.constant 0 : index
    %c0_7 = arith.constant 0 : index
    %c0_8 = arith.constant 0 : index
    %7 = vector.load %arg5[%c0_6, %c0_7, %c0_8] : memref<1x8x256xf32, #tpu.memory_space<vmem>>, vector<1x8x256xf32>
    %8 = vector.shape_cast %7 : vector<1x8x256xf32> to vector<8x256xf32>
    %9 = vector.shape_cast %6 : vector<8x256xf32> to vector<1x8x256xf32>
    tpu.vector_store %arg5[%c0_6, %c0_7, %c0_8], %9 {strides = array<i32>} : memref<1x8x256xf32, #tpu.memory_space<vmem>>, vector<1x8x256xf32>,
    return
  }
  func.func @transform_0(%arg0: i32, %arg1: i32) -> (i32, i32, i32) {
    %c0_i32 = arith.constant 0 : i32
    %c0_i32_0 = arith.constant 0 : i32
    return %arg0, %c0_i32, %arg1 : i32, i32, i32
  }
  func.func @transform_1(%arg0: i32, %arg1: i32) -> (i32, i32) {
    %c0_i32 = arith.constant 0 : i32
    %c0_i32_0 = arith.constant 0 : i32
    %c0_i32_1 = arith.constant 0 : i32
    return %c0_i32, %c0_i32_0 : i32, i32
  }
  func.func @transform_2(%arg0: i32, %arg1: i32) -> (i32, i32) {
    %c0_i32 = arith.constant 0 : i32
    %c0_i32_0 = arith.constant 0 : i32
    %c0_i32_1 = arith.constant 0 : i32
    return %c0_i32, %c0_i32_0 : i32, i32
  }
  func.func @transform_3(%arg0: i32, %arg1: i32) -> (i32, i32, i32) {
    %c0_i32 = arith.constant 0 : i32
    %c0_i32_0 = arith.constant 0 : i32
    return %arg0, %c0_i32, %arg1 : i32, i32, i32
  }
}

</mosaic_0001>

<bundles_post_ra>
// kernel: forward.1
= control target key start
LH: loop header
LB: loop body
LE: loop exit
PB: predicated region body
PF: predicated region fallthrough
CT: control target
= control target key end

     0   :  { %s479_s12 = smov 0   ;;  %s481_s13 = smov 0   ;;  %s518_s0 = inlined_call_operand.vmem [shape: f32[2,4,256], index: 0, kind: input, shape index: {}]   ;;  %s519_s1 = inlined_call_operand.vmem [shape: f32[8,4], index: 1, kind: input, shape index: {}]   ;;  %s520_s2 = inlined_call_operand.vmem [shape: f32[8,1], index: 2, kind: input, shape index: {}]   ;;  %s521_s3 = inlined_call_operand.vmem [shape: f32[2,8,256], index: 3, kind: output, shape index: {}]  }
   0x1   :  { %s483_s14 = smov 0  }
   0x2 LB: > { %s25_s15 = sadd.s32 1, %s451_s13  ;;  %p393_p0 = scmp.ge.s32.totalorder %s455_s14, 1  ;;  %s455_s14 = sphi %s483_s14, %s13_s14   ;;  %s451_s13 = sphi %s481_s13, %s523_s13   ;;  %s447_s12 = sphi %s479_s12, %s522_s12  }
   0x3   : > { %p27_p1 = scmp.ge.s32.totalorder %s25_s15, 2  ;;  %p158_p2 = scmp.lt.s32.totalorder %s455_s14, 3 }
   0x5   : > { %s525_s15 = smov (%p27_p1, %s25_s15), 0  ;;  %p159_p3 = pnand %p393_p0, %p158_p2 }
   0x6   : > { %p191_p4 = scmp.lt.s32.totalorder (!%p159_p3), %s447_s12, 1  ;;  %v457_v0 = vmov (!%p159_p3), 0.0   ;;  %v458_v1 = vmov (!%p159_p3), 0   ;;  %v211_v2 = vld [vmem:[%s520_s2] sm:$0xff] (!%p159_p3)  ;;  %vm224_vm0 = vcmask (!%p159_p3), 1043456   ;;  %vm220_vm1 = vcmask (!%p159_p3), 31744  }
   0x7   : > { %162 = sbr.rel (%p159_p3) target bundleno = 238 (0xee), region = 32  ;;  %293 = vmatprep.mubr.f32.mxu0 (!%p159_p3), %v457_v0  ;;  %431 = vset.pattern.permute.xlu0 (!%p159_p3), %v458_v1  ;;  %v210_v5 = vld [vmem:[%s519_s1] sm:$0xff] (!%p159_p3) }
   0x8   : > { %215 = vperm.xlu0 (!%p159_p3), %431, %v211_v2  }
   0xe   : > { %s527_s12 = smov (!%p191_p4, %s447_s12), 1 }
   0xf   : > { %s403_s18 = sshll.u32 %s527_s12, 3  ;;  %s404_s24 = sshll.u32 %s527_s12, 4 }
  0x10   : > { %s198_s21 = scalar_lea.vmem %s518_s0, %s403_s18  ;;  %s208_s27 = scalar_lea.vmem %s521_s3, %s404_s24 }
  0x11   : > { %v212_v3 = vld [vmem:[%s198_s21] sm:$0xff] }
  0x12   : > { %v219_v4 = vcombine.high %v212_v3, %v212_v3 }
  0x14   : > { %398 = vmatprep.subr.msk.mxu0 %vm224_vm0, %v219_v4 }
  0x15   : > { %399 = vmatpush1.msk.msra.mxu0 %vm224_vm0, %v212_v3 }
  0x16   : > { %400 = vmatmul.mubr.msk.f32.vlgmr.msra.gmra.mrb[0].mxu0 %vm220_vm1, %v210_v5 }
  0x87   : > { %v216_v6 = vpop.permute.xlu0 %215 }
  0xe9   : > { %v295_v7 = vpop.f32.mrb[0].mxu0 }
  0xea   : > { %v296_v8 = vadd.f32 %v295_v7, %v216_v6  ;;  %v297_v9 = vpop.f32.mrb[1].mxu0 }
  0xeb   : > { %v298_v10 = vadd.f32 %v297_v9, %v216_v6 }
  0xec   : > { %300 = vst [vmem:[%s208_s27] sm:$0xff] %v296_v8 }
  0xed   : > { %301 = vst [vmem:[%s208_s27 + $0x8] sm:$0xff] %v298_v10 }
  0xee PF: > { %s13_s14 = sadd.s32 1, %s455_s14   ;;  %s522_s12 = smov %s451_s13 }
  0xef   : > { %p10_p5 = scmp.ge.s32.totalorder %s13_s14, 4   ;;  %s523_s13 = smov %s525_s15 }
  0xf1   :  { %12 = sbr.rel (!%p10_p5) target bundleno = 2 (0x2), region = 62 }

</bundles_post_ra>
